<compile_context>
chip_gen: v7x
topology: tpu7x:2x2x1
jax: 0.10.0
libtpu: 0.0.40
codegen_flags: <defaults>
</compile_context>

<pallas_src>
import jax
import jax.numpy as jnp
from jax.experimental import pallas as pl
from jax.experimental.pallas import tpu as pltpu

# ---------------- config (small, deterministic) ----------------
B = 2
SEQ_LEN = 16
ENC_IN = 8          # number of series / channels
D_MODEL = 32
D_FF = 64
D_BLOCK = 24
PRED_LEN = 16
E_LAYERS = 2
EPS = 1e-5

R = B * ENC_IN      # folded matmul rows = 16

# ---------------- packed-weight slab layout (f32, rows x 128 lanes) -----------
ROW_WEMB = 0                       # (SEQ_LEN, D_MODEL)
ROW_BEMB = 16                      # (1, D_MODEL)
ROW_L0 = 24                        # first encoder layer block
#   per-layer block (all row offsets multiples of 8):
#     +0   wfg = [w1 | wg] : (D_MODEL, D_FF + D_MODEL)
#     +32  bfg = [b1 | bg] : (1, D_FF + D_MODEL)
#     +40  w2              : (D_FF, D_MODEL)
#     +104 b2              : (1, D_MODEL)
#     +112 wb              : (D_MODEL, D_BLOCK)
#     +144 bb              : (1, D_BLOCK)
LAYER_ROWS = 152
ROW_WAL = ROW_L0 + E_LAYERS * LAYER_ROWS   # 328, (D_BLOCK, PRED_LEN)
ROW_BAL = ROW_WAL + D_BLOCK                # 352, (1, PRED_LEN)
W_ROWS = 360                               # padded to a multiple of 8
W_COLS = 128


def _gelu(x):
    return jax.nn.gelu(x, approximate=True)


# ---------------- Pallas kernel (single invocation, no grid) ------------------
def deepboots_kernel(x_ref,    # (B, SEQ_LEN, ENC_IN)  f32
                     w_ref,    # (W_ROWS, W_COLS)      f32 packed weights
                     o_ref):   # (B, PRED_LEN, ENC_IN) f32
    # ---- fold batch into rows + transpose to channel-as-token layout --------
    x = jnp.concatenate([x_ref[b].T for b in range(B)], axis=0)   # (R, SEQ_LEN)

    # ---- standard_scaler.transform -------------------------------------------
    mean = jnp.mean(x, axis=-1, keepdims=True)                    # (R, 1)
    var = jnp.mean((x - mean) ** 2, axis=-1, keepdims=True)
    std = jnp.sqrt(var + EPS)
    xn = (x - mean) / std

    def bdot(a, w):   # bf16 MXU inputs, f32 accumulation
        return jnp.dot(a.astype(jnp.bfloat16), w.astype(jnp.bfloat16),
                       preferred_element_type=jnp.float32)

    # ---- embed: Linear(seq_len -> d_model) -----------------------------------
    wemb = w_ref[ROW_WEMB:ROW_WEMB + SEQ_LEN, :D_MODEL]
    bemb = w_ref[ROW_BEMB:ROW_BEMB + 1, :D_MODEL]
    h = bdot(xn, wemb) + bemb                                     # (R, D_MODEL)

    # ---- backbone: dual-stream residual boosting encoder ---------------------
    out = jnp.zeros((R, D_BLOCK), jnp.float32)
    for l in range(E_LAYERS):                                     # static unroll
        base = ROW_L0 + l * LAYER_ROWS
        wfg = w_ref[base:base + D_MODEL, :D_FF + D_MODEL]         # (32, 96)
        bfg = w_ref[base + 32:base + 33, :D_FF + D_MODEL]         # (1, 96)
        w2 = w_ref[base + 40:base + 40 + D_FF, :D_MODEL]          # (64, 32)
        b2 = w_ref[base + 104:base + 105, :D_MODEL]               # (1, 32)
        wb = w_ref[base + 112:base + 112 + D_MODEL, :D_BLOCK]     # (32, 24)
        bb = w_ref[base + 144:base + 145, :D_BLOCK]               # (1, 24)

        hp = bdot(h, wfg) + bfg                                   # fused w1|wg
        y = _gelu(hp[:, :D_FF])                                   # FFN branch
        g = jax.nn.sigmoid(hp[:, D_FF:D_FF + D_MODEL])            # gate branch
        y = bdot(y, w2) + b2
        y = g * y
        out = out + bdot(y, wb) + bb                              # boosting sum
        h = h - y                                                 # residual stream
    # norm_layer(LayerNorm(d_model)) acts on `h`, which is not used further.

    # ---- align: Linear(d_block -> pred_len) + standard_scaler.inverted -------
    wal = w_ref[ROW_WAL:ROW_WAL + D_BLOCK, :PRED_LEN]
    bal = w_ref[ROW_BAL:ROW_BAL + 1, :PRED_LEN]
    o = bdot(out, wal) + bal                                      # (R, PRED_LEN)
    o = o * std + mean

    # ---- store directly in the module's output layout (B, PRED_LEN, ENC_IN) --
    for b in range(B):
        o_ref[b] = o[b * ENC_IN:(b + 1) * ENC_IN, :].T            # (P, C)


# ---------------- host-side weight packing (done once at init time) -----------
def pack_params(p):
    slab = jnp.zeros((W_ROWS, W_COLS), jnp.float32)
    slab = slab.at[ROW_WEMB:ROW_WEMB + SEQ_LEN, :D_MODEL].set(p["wemb"])
    slab = slab.at[ROW_BEMB:ROW_BEMB + 1, :D_MODEL].set(p["bemb"])
    for l in range(E_LAYERS):
        base = ROW_L0 + l * LAYER_ROWS
        slab = slab.at[base:base + D_MODEL, :D_FF].set(p["w1"][l])
        slab = slab.at[base:base + D_MODEL, D_FF:D_FF + D_MODEL].set(p["wg"][l])
        slab = slab.at[base + 32:base + 33, :D_FF].set(p["b1"][l])
        slab = slab.at[base + 32:base + 33, D_FF:D_FF + D_MODEL].set(p["bg"][l])
        slab = slab.at[base + 40:base + 40 + D_FF, :D_MODEL].set(p["w2"][l])
        slab = slab.at[base + 104:base + 105, :D_MODEL].set(p["b2"][l])
        slab = slab.at[base + 112:base + 112 + D_MODEL, :D_BLOCK].set(p["wb"][l])
        slab = slab.at[base + 144:base + 145, :D_BLOCK].set(p["bb"][l])
    slab = slab.at[ROW_WAL:ROW_WAL + D_BLOCK, :PRED_LEN].set(p["wal"])
    slab = slab.at[ROW_BAL:ROW_BAL + 1, :PRED_LEN].set(p["bal"])
    return slab


def deepboots_forward(x, x_mark, w_packed):
    """x: (B, seq_len, enc_in); returns (B, pred_len, enc_in)."""
    if x_mark is not None:
        # TODO(synk): x_mark concat branch not lowered (see module header note).
        raise NotImplementedError("x_mark path not supported in this kernel")
    return pl.pallas_call(
        deepboots_kernel,
        out_shape=jax.ShapeDtypeStruct((B, PRED_LEN, ENC_IN), jnp.float32),
        in_specs=[pl.BlockSpec(memory_space=pltpu.MemorySpace.VMEM),
                  pl.BlockSpec(memory_space=pltpu.MemorySpace.VMEM)],
        out_specs=pl.BlockSpec(memory_space=pltpu.MemorySpace.VMEM),
    )(x, w_packed)


# ---------------- plain-JAX reference (mirrors the kernel's bf16 dots) --------
def reference_forward(x, x_mark, params):
    del x_mark
    xp = jnp.transpose(x, (0, 2, 1)).astype(jnp.float32)          # (B, C, L)
    mean = jnp.mean(xp, axis=-1, keepdims=True)
    var = jnp.mean((xp - mean) ** 2, axis=-1, keepdims=True)
    std = jnp.sqrt(var + EPS)
    xn = (xp - mean) / std

    def bdot(a, w):
        return jax.lax.dot_general(
            a.astype(jnp.bfloat16), w.astype(jnp.bfloat16),
            dimension_numbers=(((a.ndim - 1,), (0,)), ((), ())),
            preferred_element_type=jnp.float32)

    h = bdot(xn, params["wemb"]) + params["bemb"]
    out = jnp.zeros((x.shape[0], ENC_IN, D_BLOCK), jnp.float32)
    for l in range(E_LAYERS):
        y = _gelu(bdot(h, params["w1"][l]) + params["b1"][l])
        g = jax.nn.sigmoid(bdot(h, params["wg"][l]) + params["bg"][l])
        y = bdot(y, params["w2"][l]) + params["b2"][l]
        y = g * y
        out = out + bdot(y, params["wb"][l]) + params["bb"][l]
        h = h - y
    o = bdot(out, params["wal"]) + params["bal"]
    o = o * std + mean
    return jnp.transpose(o, (0, 2, 1))                            # (B, P, C)


# ---------------- deterministic parameter init --------------------------------
def init_params(key):
    ks = jax.random.split(key, 12)

    def lin(k, shape, fan_in):
        return jax.random.normal(k, shape, jnp.float32) / jnp.sqrt(fan_in)

    return dict(
        wemb=lin(ks[0], (SEQ_LEN, D_MODEL), SEQ_LEN),
        bemb=0.01 * jax.random.normal(ks[1], (1, D_MODEL), jnp.float32),
        w1=lin(ks[2], (E_LAYERS, D_MODEL, D_FF), D_MODEL),
        b1=0.01 * jax.random.normal(ks[3], (E_LAYERS, 1, D_FF), jnp.float32),
        w2=lin(ks[4], (E_LAYERS, D_FF, D_MODEL), D_FF),
        b2=0.01 * jax.random.normal(ks[5], (E_LAYERS, 1, D_MODEL), jnp.float32),
        wg=lin(ks[6], (E_LAYERS, D_MODEL, D_MODEL), D_MODEL),
        bg=0.01 * jax.random.normal(ks[7], (E_LAYERS, 1, D_MODEL), jnp.float32),
        wb=lin(ks[8], (E_LAYERS, D_MODEL, D_BLOCK), D_MODEL),
        bb=0.01 * jax.random.normal(ks[9], (E_LAYERS, 1, D_BLOCK), jnp.float32),
        wal=lin(ks[10], (D_BLOCK, PRED_LEN), D_BLOCK),
        bal=0.01 * jax.random.normal(ks[11], (1, PRED_LEN), jnp.float32),
    )


if __name__ == "__main__":
    key = jax.random.PRNGKey(0)
    kx, kp = jax.random.split(key)
    x = jax.random.normal(kx, (B, SEQ_LEN, ENC_IN), jnp.float32)
    params = init_params(kp)
    w_packed = jax.block_until_ready(pack_params(params))   # one-time packing

    out = deepboots_forward(x, None, w_packed)
    out = jax.block_until_ready(out)

    assert out.shape == (B, PRED_LEN, ENC_IN), out.shape
    ref = reference_forward(x, None, params)
    err = float(jnp.max(jnp.abs(out - ref)))
    assert jnp.allclose(out, ref, atol=2e-2, rtol=2e-2), f"max abs err {err}"
    print("KERNEL_OK")
</pallas_src>

<mosaic_0001>
module attributes {stable_mosaic.version = 11 : i64} {
  func.func @deepboots_kernel(%arg0: memref<2x16x8xf32, #tpu.memory_space<vmem>>, %arg1: memref<360x128xf32, #tpu.memory_space<vmem>>, %arg2: memref<2x16x8xf32, #tpu.memory_space<vmem>>) attributes {dimension_semantics = [], scalar_prefetch = 0 : i64, scratch_operands = 0 : i64, tpu.core_type = #tpu.core_type<tc>} {
    %c0 = arith.constant 0 : index
    %c0_0 = arith.constant 0 : index
    %c0_1 = arith.constant 0 : index
    %0 = vector.load %arg0[%c0, %c0_0, %c0_1] : memref<2x16x8xf32, #tpu.memory_space<vmem>>, vector<1x16x8xf32>
    %1 = vector.shape_cast %0 : vector<1x16x8xf32> to vector<16x8xf32>
    %2 = tpu.transpose %1, [1, 0] : vector<16x8xf32> -> vector<8x16xf32>
    %c1 = arith.constant 1 : index
    %c0_2 = arith.constant 0 : index
    %c0_3 = arith.constant 0 : index
    %3 = vector.load %arg0[%c1, %c0_2, %c0_3] : memref<2x16x8xf32, #tpu.memory_space<vmem>>, vector<1x16x8xf32>
    %4 = vector.shape_cast %3 : vector<1x16x8xf32> to vector<16x8xf32>
    %5 = tpu.transpose %4, [1, 0] : vector<16x8xf32> -> vector<8x16xf32>
    %6 = tpu.concatenate %2, %5 in 0 : vector<8x16xf32>, vector<8x16xf32> -> vector<16x16xf32>
    %cst = arith.constant dense<0.000000e+00> : vector<16xf32>
    %7 = vector.multi_reduction <add>, %6, %cst [1] : vector<16x16xf32> to vector<16xf32>
    %8 = vector.shape_cast %7 : vector<16xf32> to vector<16x1xf32>
    %cst_4 = arith.constant 1.600000e+01 : f32
    %9 = vector.broadcast %cst_4 : f32 to vector<16x1xf32>
    %10 = arith.divf %8, %9 : vector<16x1xf32>
    %11 = vector.broadcast %10 : vector<16x1xf32> to vector<16x16xf32>
    %12 = arith.subf %6, %11 : vector<16x16xf32>
    %13 = arith.mulf %12, %12 : vector<16x16xf32>
    %cst_5 = arith.constant dense<0.000000e+00> : vector<16xf32>
    %14 = vector.multi_reduction <add>, %13, %cst_5 [1] : vector<16x16xf32> to vector<16xf32>
    %15 = vector.shape_cast %14 : vector<16xf32> to vector<16x1xf32>
    %cst_6 = arith.constant 1.600000e+01 : f32
    %16 = vector.broadcast %cst_6 : f32 to vector<16x1xf32>
    %17 = arith.divf %15, %16 : vector<16x1xf32>
    %cst_7 = arith.constant 9.99999974E-6 : f32
    %18 = vector.broadcast %cst_7 : f32 to vector<16x1xf32>
    %19 = arith.addf %17, %18 : vector<16x1xf32>
    %20 = math.sqrt %19 : vector<16x1xf32>
    %21 = vector.broadcast %10 : vector<16x1xf32> to vector<16x16xf32>
    %22 = arith.subf %6, %21 : vector<16x16xf32>
    %23 = vector.broadcast %20 : vector<16x1xf32> to vector<16x16xf32>
    %24 = arith.divf %22, %23 : vector<16x16xf32>
    %c0_8 = arith.constant 0 : index
    %c0_9 = arith.constant 0 : index
    %25 = vector.load %arg1[%c0_8, %c0_9] : memref<360x128xf32, #tpu.memory_space<vmem>>, vector<16x32xf32>
    %c16 = arith.constant 16 : index
    %c0_10 = arith.constant 0 : index
    %26 = vector.load %arg1[%c16, %c0_10] : memref<360x128xf32, #tpu.memory_space<vmem>>, vector<1x32xf32>
    %27 = arith.truncf %24 : vector<16x16xf32> to vector<16x16xbf16>
    %28 = arith.truncf %25 : vector<16x32xf32> to vector<16x32xbf16>
    %cst_11 = arith.constant dense<0.000000e+00> : vector<16x32xf32>
    %29 = tpu.matmul %27, %28, %cst_11 {dimension_numbers = #tpu.dot_dimension_numbers<[1], [0], [0], [1], [0, 0, 1, 1], [], []>} : vector<16x16xbf16>, vector<16x32xbf16>, vector<16x32xf32> -> vector<16x32xf32>
    %30 = vector.broadcast %26 : vector<1x32xf32> to vector<16x32xf32>
    %31 = arith.addf %29, %30 : vector<16x32xf32>
    %cst_12 = arith.constant 0.000000e+00 : f32
    %32 = vector.broadcast %cst_12 : f32 to vector<16x24xf32>
    %c24 = arith.constant 24 : index
    %c0_13 = arith.constant 0 : index
    %33 = vector.load %arg1[%c24, %c0_13] : memref<360x128xf32, #tpu.memory_space<vmem>>, vector<32x96xf32>
    %c56 = arith.constant 56 : index
    %c0_14 = arith.constant 0 : index
    %34 = vector.load %arg1[%c56, %c0_14] : memref<360x128xf32, #tpu.memory_space<vmem>>, vector<1x96xf32>
    %c64 = arith.constant 64 : index
    %c0_15 = arith.constant 0 : index
    %35 = vector.load %arg1[%c64, %c0_15] : memref<360x128xf32, #tpu.memory_space<vmem>>, vector<64x32xf32>
    %c128 = arith.constant 128 : index
    %c0_16 = arith.constant 0 : index
    %36 = vector.load %arg1[%c128, %c0_16] : memref<360x128xf32, #tpu.memory_space<vmem>>, vector<1x32xf32>
    %c136 = arith.constant 136 : index
    %c0_17 = arith.constant 0 : index
    %37 = vector.load %arg1[%c136, %c0_17] : memref<360x128xf32, #tpu.memory_space<vmem>>, vector<32x24xf32>
    %c168 = arith.constant 168 : index
    %c0_18 = arith.constant 0 : index
    %38 = vector.load %arg1[%c168, %c0_18] : memref<360x128xf32, #tpu.memory_space<vmem>>, vector<1x24xf32>
    %39 = arith.truncf %31 : vector<16x32xf32> to vector<16x32xbf16>
    %40 = arith.truncf %33 : vector<32x96xf32> to vector<32x96xbf16>
    %cst_19 = arith.constant dense<0.000000e+00> : vector<16x96xf32>
    %41 = tpu.matmul %39, %40, %cst_19 {dimension_numbers = #tpu.dot_dimension_numbers<[1], [0], [0], [1], [0, 0, 1, 1], [], []>} : vector<16x32xbf16>, vector<32x96xbf16>, vector<16x96xf32> -> vector<16x96xf32>
    %42 = vector.broadcast %34 : vector<1x96xf32> to vector<16x96xf32>
    %43 = arith.addf %41, %42 : vector<16x96xf32>
    %44 = vector.extract_strided_slice %43 {offsets = [0, 0], sizes = [16, 64], strides = [1, 1]} : vector<16x96xf32> to vector<16x64xf32>
    %45 = arith.mulf %44, %44 : vector<16x64xf32>
    %46 = arith.mulf %44, %45 : vector<16x64xf32>
    %cst_20 = arith.constant 4.471500e-02 : f32
    %47 = vector.broadcast %cst_20 : f32 to vector<16x64xf32>
    %48 = arith.mulf %47, %46 : vector<16x64xf32>
    %49 = arith.addf %44, %48 : vector<16x64xf32>
    %cst_21 = arith.constant 0.797884583 : f32
    %50 = vector.broadcast %cst_21 : f32 to vector<16x64xf32>
    %51 = arith.mulf %50, %49 : vector<16x64xf32>
    %52 = math.tanh %51 : vector<16x64xf32>
    %cst_22 = arith.constant 1.000000e+00 : f32
    %53 = vector.broadcast %cst_22 : f32 to vector<16x64xf32>
    %54 = arith.addf %53, %52 : vector<16x64xf32>
    %cst_23 = arith.constant 5.000000e-01 : f32
    %55 = vector.broadcast %cst_23 : f32 to vector<16x64xf32>
    %56 = arith.mulf %55, %54 : vector<16x64xf32>
    %57 = arith.mulf %44, %56 : vector<16x64xf32>
    %58 = vector.extract_strided_slice %43 {offsets = [0, 64], sizes = [16, 32], strides = [1, 1]} : vector<16x96xf32> to vector<16x32xf32>
    %59 = arith.negf %58 : vector<16x32xf32>
    %60 = math.exp %59 : vector<16x32xf32>
    %cst_24 = arith.constant 1.000000e+00 : f32
    %61 = vector.broadcast %cst_24 : f32 to vector<16x32xf32>
    %62 = arith.addf %61, %60 : vector<16x32xf32>
    %63 = arith.divf %61, %62 : vector<16x32xf32>
    %64 = arith.truncf %57 : vector<16x64xf32> to vector<16x64xbf16>
    %65 = arith.truncf %35 : vector<64x32xf32> to vector<64x32xbf16>
    %cst_25 = arith.constant dense<0.000000e+00> : vector<16x32xf32>
    %66 = tpu.matmul %64, %65, %cst_25 {dimension_numbers = #tpu.dot_dimension_numbers<[1], [0], [0], [1], [0, 0, 1, 1], [], []>} : vector<16x64xbf16>, vector<64x32xbf16>, vector<16x32xf32> -> vector<16x32xf32>
    %67 = vector.broadcast %36 : vector<1x32xf32> to vector<16x32xf32>
    %68 = arith.addf %66, %67 : vector<16x32xf32>
    %69 = arith.mulf %63, %68 : vector<16x32xf32>
    %70 = arith.truncf %69 : vector<16x32xf32> to vector<16x32xbf16>
    %71 = arith.truncf %37 : vector<32x24xf32> to vector<32x24xbf16>
    %cst_26 = arith.constant dense<0.000000e+00> : vector<16x24xf32>
    %72 = tpu.matmul %70, %71, %cst_26 {dimension_numbers = #tpu.dot_dimension_numbers<[1], [0], [0], [1], [0, 0, 1, 1], [], []>} : vector<16x32xbf16>, vector<32x24xbf16>, vector<16x24xf32> -> vector<16x24xf32>
    %73 = arith.addf %32, %72 : vector<16x24xf32>
    %74 = vector.broadcast %38 : vector<1x24xf32> to vector<16x24xf32>
    %75 = arith.addf %73, %74 : vector<16x24xf32>
    %76 = arith.subf %31, %69 : vector<16x32xf32>
    %c176 = arith.constant 176 : index
    %c0_27 = arith.constant 0 : index
    %77 = vector.load %arg1[%c176, %c0_27] : memref<360x128xf32, #tpu.memory_space<vmem>>, vector<32x96xf32>
    %c208 = arith.constant 208 : index
    %c0_28 = arith.constant 0 : index
    %78 = vector.load %arg1[%c208, %c0_28] : memref<360x128xf32, #tpu.memory_space<vmem>>, vector<1x96xf32>
    %c216 = arith.constant 216 : index
    %c0_29 = arith.constant 0 : index
    %79 = vector.load %arg1[%c216, %c0_29] : memref<360x128xf32, #tpu.memory_space<vmem>>, vector<64x32xf32>
    %c280 = arith.constant 280 : index
    %c0_30 = arith.constant 0 : index
    %80 = vector.load %arg1[%c280, %c0_30] : memref<360x128xf32, #tpu.memory_space<vmem>>, vector<1x32xf32>
    %c288 = arith.constant 288 : index
    %c0_31 = arith.constant 0 : index
    %81 = vector.load %arg1[%c288, %c0_31] : memref<360x128xf32, #tpu.memory_space<vmem>>, vector<32x24xf32>
    %c320 = arith.constant 320 : index
    %c0_32 = arith.constant 0 : index
    %82 = vector.load %arg1[%c320, %c0_32] : memref<360x128xf32, #tpu.memory_space<vmem>>, vector<1x24xf32>
    %83 = arith.truncf %76 : vector<16x32xf32> to vector<16x32xbf16>
    %84 = arith.truncf %77 : vector<32x96xf32> to vector<32x96xbf16>
    %cst_33 = arith.constant dense<0.000000e+00> : vector<16x96xf32>
    %85 = tpu.matmul %83, %84, %cst_33 {dimension_numbers = #tpu.dot_dimension_numbers<[1], [0], [0], [1], [0, 0, 1, 1], [], []>} : vector<16x32xbf16>, vector<32x96xbf16>, vector<16x96xf32> -> vector<16x96xf32>
    %86 = vector.broadcast %78 : vector<1x96xf32> to vector<16x96xf32>
    %87 = arith.addf %85, %86 : vector<16x96xf32>
    %88 = vector.extract_strided_slice %87 {offsets = [0, 0], sizes = [16, 64], strides = [1, 1]} : vector<16x96xf32> to vector<16x64xf32>
    %89 = arith.mulf %88, %88 : vector<16x64xf32>
    %90 = arith.mulf %88, %89 : vector<16x64xf32>
    %cst_34 = arith.constant 4.471500e-02 : f32
    %91 = vector.broadcast %cst_34 : f32 to vector<16x64xf32>
    %92 = arith.mulf %91, %90 : vector<16x64xf32>
    %93 = arith.addf %88, %92 : vector<16x64xf32>
    %cst_35 = arith.constant 0.797884583 : f32
    %94 = vector.broadcast %cst_35 : f32 to vector<16x64xf32>
    %95 = arith.mulf %94, %93 : vector<16x64xf32>
    %96 = math.tanh %95 : vector<16x64xf32>
    %cst_36 = arith.constant 1.000000e+00 : f32
    %97 = vector.broadcast %cst_36 : f32 to vector<16x64xf32>
    %98 = arith.addf %97, %96 : vector<16x64xf32>
    %cst_37 = arith.constant 5.000000e-01 : f32
    %99 = vector.broadcast %cst_37 : f32 to vector<16x64xf32>
    %100 = arith.mulf %99, %98 : vector<16x64xf32>
    %101 = arith.mulf %88, %100 : vector<16x64xf32>
    %102 = vector.extract_strided_slice %87 {offsets = [0, 64], sizes = [16, 32], strides = [1, 1]} : vector<16x96xf32> to vector<16x32xf32>
    %103 = arith.negf %102 : vector<16x32xf32>
    %104 = math.exp %103 : vector<16x32xf32>
    %cst_38 = arith.constant 1.000000e+00 : f32
    %105 = vector.broadcast %cst_38 : f32 to vector<16x32xf32>
    %106 = arith.addf %105, %104 : vector<16x32xf32>
    %107 = arith.divf %105, %106 : vector<16x32xf32>
    %108 = arith.truncf %101 : vector<16x64xf32> to vector<16x64xbf16>
    %109 = arith.truncf %79 : vector<64x32xf32> to vector<64x32xbf16>
    %cst_39 = arith.constant dense<0.000000e+00> : vector<16x32xf32>
    %110 = tpu.matmul %108, %109, %cst_39 {dimension_numbers = #tpu.dot_dimension_numbers<[1], [0], [0], [1], [0, 0, 1, 1], [], []>} : vector<16x64xbf16>, vector<64x32xbf16>, vector<16x32xf32> -> vector<16x32xf32>
    %111 = vector.broadcast %80 : vector<1x32xf32> to vector<16x32xf32>
    %112 = arith.addf %110, %111 : vector<16x32xf32>
    %113 = arith.mulf %107, %112 : vector<16x32xf32>
    %114 = arith.truncf %113 : vector<16x32xf32> to vector<16x32xbf16>
    %115 = arith.truncf %81 : vector<32x24xf32> to vector<32x24xbf16>
    %cst_40 = arith.constant dense<0.000000e+00> : vector<16x24xf32>
    %116 = tpu.matmul %114, %115, %cst_40 {dimension_numbers = #tpu.dot_dimension_numbers<[1], [0], [0], [1], [0, 0, 1, 1], [], []>} : vector<16x32xbf16>, vector<32x24xbf16>, vector<16x24xf32> -> vector<16x24xf32>
    %117 = arith.addf %75, %116 : vector<16x24xf32>
    %118 = vector.broadcast %82 : vector<1x24xf32> to vector<16x24xf32>
    %119 = arith.addf %117, %118 : vector<16x24xf32>
    %c328 = arith.constant 328 : index
    %c0_41 = arith.constant 0 : index
    %120 = vector.load %arg1[%c328, %c0_41] : memref<360x128xf32, #tpu.memory_space<vmem>>, vector<24x16xf32>
    %c352 = arith.constant 352 : index
    %c0_42 = arith.constant 0 : index
    %121 = vector.load %arg1[%c352, %c0_42] : memref<360x128xf32, #tpu.memory_space<vmem>>, vector<1x16xf32>
    %122 = arith.truncf %119 : vector<16x24xf32> to vector<16x24xbf16>
    %123 = arith.truncf %120 : vector<24x16xf32> to vector<24x16xbf16>
    %cst_43 = arith.constant dense<0.000000e+00> : vector<16x16xf32>
    %124 = tpu.matmul %122, %123, %cst_43 {dimension_numbers = #tpu.dot_dimension_numbers<[1], [0], [0], [1], [0, 0, 1, 1], [], []>} : vector<16x24xbf16>, vector<24x16xbf16>, vector<16x16xf32> -> vector<16x16xf32>
    %125 = vector.broadcast %121 : vector<1x16xf32> to vector<16x16xf32>
    %126 = arith.addf %124, %125 : vector<16x16xf32>
    %127 = vector.broadcast %20 : vector<16x1xf32> to vector<16x16xf32>
    %128 = arith.mulf %126, %127 : vector<16x16xf32>
    %129 = vector.broadcast %10 : vector<16x1xf32> to vector<16x16xf32>
    %130 = arith.addf %128, %129 : vector<16x16xf32>
    %131 = vector.extract_strided_slice %130 {offsets = [0, 0], sizes = [8, 16], strides = [1, 1]} : vector<16x16xf32> to vector<8x16xf32>
    %132 = tpu.transpose %131, [1, 0] : vector<8x16xf32> -> vector<16x8xf32>
    %c0_44 = arith.constant 0 : index
    %c0_45 = arith.constant 0 : index
    %c0_46 = arith.constant 0 : index
    %133 = vector.load %arg2[%c0_44, %c0_45, %c0_46] : memref<2x16x8xf32, #tpu.memory_space<vmem>>, vector<1x16x8xf32>
    %134 = vector.shape_cast %133 : vector<1x16x8xf32> to vector<16x8xf32>
    %135 = vector.shape_cast %132 : vector<16x8xf32> to vector<1x16x8xf32>
    tpu.vector_store %arg2[%c0_44, %c0_45, %c0_46], %135 {strides = array<i32>} : memref<2x16x8xf32, #tpu.memory_space<vmem>>, vector<1x16x8xf32>,
    %136 = vector.extract_strided_slice %130 {offsets = [8, 0], sizes = [8, 16], strides = [1, 1]} : vector<16x16xf32> to vector<8x16xf32>
    %137 = tpu.transpose %136, [1, 0] : vector<8x16xf32> -> vector<16x8xf32>
    %c1_47 = arith.constant 1 : index
    %c0_48 = arith.constant 0 : index
    %c0_49 = arith.constant 0 : index
    %138 = vector.load %arg2[%c1_47, %c0_48, %c0_49] : memref<2x16x8xf32, #tpu.memory_space<vmem>>, vector<1x16x8xf32>
    %139 = vector.shape_cast %138 : vector<1x16x8xf32> to vector<16x8xf32>
    %140 = vector.shape_cast %137 : vector<16x8xf32> to vector<1x16x8xf32>
    tpu.vector_store %arg2[%c1_47, %c0_48, %c0_49], %140 {strides = array<i32>} : memref<2x16x8xf32, #tpu.memory_space<vmem>>, vector<1x16x8xf32>,
    return
  }
}

</mosaic_0001>

<bundles_post_ra>
// kernel: tpu_custom_call.1
= control target key start
LH: loop header
LB: loop body
LE: loop exit
PB: predicated region body
PF: predicated region fallthrough
CT: control target
= control target key end

     0   :  { %7 = vsyncpa [#allocation3], 0  ;;  %s962_s9 = smov [#allocation2]   ;;  %s1103_s0 = inlined_call_operand.vmem [shape: f32[2,16,8], index: 0, kind: input, shape index: {}]   ;;  %s1104_s1 = inlined_call_operand.hbm [shape: f32[360,128], index: 1, kind: input, shape index: {}]   ;;  %s1105_s2 = inlined_call_operand.vmem [shape: f32[2,16,8], index: 2, kind: output, shape index: {}]  }
   0x1   :  { %s15_s10 = sshll.u32 %s962_s9, 4  ;;  %s938_s13 = scalar_lea.hbm %s1104_s1, 5760  ;;  %s16_s10 = int_to_ptr.vmem [resolvable:$true] %s15_s10 }
   0x2   :  { %p939_p0 = scmp.ne.s32.totalorder %s1104_s1, %s938_s13  ;;  %p942_p1 = scmp.lt.u32.totalorder %s938_s13, %s1104_s1 }
   0x4   :  { %p944_p2 = pnand %p942_p1, %p939_p0 }
   0x6   :  { %947 = shalt.err (!%p944_p2)
}
   0x7   :  { %s948_s18 = scalar_lea.vmem %s16_s10, 5760  ;;  %p953_p4 = scmp.lt.s32.totalorder %s16_s10, %s16_s10 }
   0x8   :  { %p949_p3 = scmp.ne.s32.totalorder %s16_s10, %s948_s18  ;;  %p954_p5 = scmp.lt.s32.totalorder %s948_s18, %s948_s18 }
   0xa   :  { %p955_p6 = por %p954_p5, %p953_p4 }
   0xc   :  { %p956_p7 = pnand %p955_p6, %p949_p3 }
   0xe   :  { %959 = shalt.err (!%p956_p7)
}
   0xf   :  { %s963_s19 = smov 128   ;;  %s964_s20 = smov 8  }
  0x10   :  { %21 = dma.hbm_to_vmem [thread:$0]  %s1104_s1, 5760, %s16_s10, [#allocation3], %s963_s19, %s963_s19, %s964_s20  }
  0x11   :  { %960 = dma.done.wait [#allocation3], 5760  }
  0x12   :  { %961 = vsyncadd [#allocation3], 4294961536  ;;  %v779_v0 = vld [vmem:[%s1103_s0 + $0x10] sm:$0xff]  ;;  %v26_v1 = vld [vmem:[%s1103_s0] sm:$0xff]  ;;  %vm95_vm0 = vcmask 130048   ;;  %v965_v20 = vmov 0.0  }
  0x13   :  { %63 = vxpose.xlu1.b32.start [1/2] (short) (narrow) %v779_v0, 8  ;;  %28 = vxpose.xlu0.b32.start [1/2] (short) (narrow) %v26_v1, 8  ;;  %v780_v2 = vld [vmem:[%s1103_s0 + $0x18] sm:$0xff]  ;;  %v27_v3 = vld [vmem:[%s1103_s0 + $0x8] sm:$0xff]  ;;  %v137_v18 = vld [vmem:[#allocation2] sm:$0xff]  ;;  %vm966_vm1 = vmmov 0  }
  0x14   :  { %v138_v19 = vld [vmem:[#allocation2 + $0x8] sm:$0xff]  ;;  %830 = vmatprep.subr.bf16.mxu0 %v965_v20  ;;  %832 = vmatprep.mubr.msk.bf16.mxu0 %vm966_vm1, %v965_v20  ;;  %v190_v43 = vld [vmem:[#allocation2 + $0x18] sm:$0xff]  ;;  %v191_v44 = vld [vmem:[#allocation2 + $0x20] sm:$0xff]  ;;  %vm216_vm6 = vcmask 261120   ;;  %vm300_vm7 = vcmask 523264   ;;  %s967_s0 = smov 64  }
  0x15   :  { %v141_v21 = vpack.c.bf16 %v138_v19, %v137_v18  ;;  %836 = vmatprep.subr.bf16.mxu1 %v965_v20  ;;  %840 = vmatprep.mubr.msk.bf16.mxu1 %vm966_vm1, %v965_v20  ;;  %v210_v45 = vpack.c.bf16 %v191_v44, %v190_v43  ;;  %v192_v46 = vld [vmem:[#allocation2 + $0x28] sm:$0xff]  ;;  %v193_v47 = vld [vmem:[#allocation2 + $0x30] sm:$0xff]  ;;  %v195_v57 = vld [vmem:[#allocation2 + $0x40] sm:$0xff]  ;;  %vm655_vm8 = vcmask 1043456   ;;  %vm651_vm9 = vcmask 195584  }
  0x16   :  { %v211_v48 = vpack.c.bf16 %v193_v47, %v192_v46  ;;  %v781_v49 = vld [vmem:[#allocation2 + $0x10] ss:$0 sm:$0xff]  ;;  %v196_v58 = vld [vmem:[#allocation2 + $0x48] sm:$0xff]  ;;  %v198_v61 = vld [vmem:[#allocation2 + $0x58] sm:$0xff]  ;;  %vm736_vm10 = vcmask 64512  }
  0x17   :  { %64 = vxpose.xlu1.b32.end [2/2] (short) (narrow) %v780_v2, 8  ;;  %29 = vxpose.xlu0.b32.end [2/2] (short) (narrow) %v27_v3, 8  ;;  %v292_v59 = vpack.c.bf16 %v196_v58, %v195_v57  ;;  %v197_v60 = vld [vmem:[#allocation2 + $0x50] sm:$0xff]  ;;  %v199_v63 = vld [vmem:[#allocation2 + $0x60] sm:$0xff]  ;;  %v200_v0 = vld [vmem:[#allocation2 + $0x68] sm:$0xff] }
  0x18   :  { %831 = vmatpush3.bf16.msra.mxu0 %v141_v21  ;;  %837 = vmatpush3.bf16.msra.mxu1 %v210_v45  ;;  %v293_v62 = vpack.c.bf16 %v198_v61, %v197_v60  ;;  %v294_v1 = vpack.c.bf16 %v200_v0, %v199_v63  ;;  %v201_v2 = vld [vmem:[#allocation2 + $0x70] sm:$0xff]  ;;  %v202_v3 = vld [vmem:[#allocation2 + $0x78] sm:$0xff] }
  0x19   :  { %844 = vmatprep.subr.bf16.mxu0 %v965_v20  ;;  %838 = vmatprep.subr.bf16.mxu1 %v965_v20  ;;  %v419_v0 = vld [vmem:[#allocation2 + $0xb0] sm:$0xff] }
  0x1c   :  { %839 = vmatpush3.bf16.msra.mxu1 %v211_v48 }
  0x1d   :  { %856 = vmatprep.subr.bf16.mxu1 %v965_v20 }
  0x93   :  { %v79_v4 = vpop.trf.xlu1  ;;  %v44_v5 = vpop.trf.xlu0 }
  0x94   :  { %v99_v6 = vsel %vm95_vm0, %v79_v4, 0.0  ;;  %v96_v7 = vsel %vm95_vm0, %v44_v5, 0.0 }
  0x95   :  { %100 = vadd.xlane.f32.xlu1 %v99_v6  ;;  %97 = vadd.xlane.f32.xlu0 %v96_v7 }
 0x122   :  { %v101_v8 = vpop.xlane.xlu1 %100  ;;  %v98_v9 = vpop.xlane.xlu0 %97 }
 0x123   :  { %v1009_v10 = vmul.f32 0.0625, %v101_v8  ;;  %v1011_v11 = vmul.f32 0.0625, %v98_v9 }
 0x125   :  { %v106_v12 = vsub.f32 %v79_v4, %v1009_v10  ;;  %v105_v13 = vsub.f32 %v44_v5, %v1011_v11  ;;  %v295_v4 = vpack.c.bf16 %v202_v3, %v201_v2  ;;  %v783_v5 = vld [vmem:[#allocation2 + $0x38] ss:$0 sm:$0xff]  ;;  %v421_v3 = vld [vmem:[#allocation2 + $0xc0] sm:$0xff] }
 0x127   :  { %v107_v14 = vmul.f32 %v105_v13, %v105_v13  ;;  %v108_v16 = vmul.f32 %v106_v12, %v106_v12 }
 0x129   :  { %v109_v15 = vsel %vm95_vm0, %v107_v14, 0.0  ;;  %v112_v17 = vsel %vm95_vm0, %v108_v16, 0.0 }
 0x12a   :  { %110 = vadd.xlane.f32.xlu1 %v109_v15 }
 0x12e   :  { %113 = vadd.xlane.f32.xlu1 %v112_v17 }
 0x1b7   :  { %v111_v22 = vpop.xlane.xlu1 %110 }
 0x1b8   :  { %v115_v23 = vmul.f32 0.0625, %v111_v22 }
 0x1ba   :  { %v117_v24 = vadd.f32 1e-05, %v115_v23 }
 0x1bb   :  { %v114_v25 = vpop.xlane.xlu1 %113 }
 0x1bc   :  { %906 = vrsqrt.f32 %v117_v24  ;;  %v116_v26 = vmul.f32 0.0625, %v114_v25  ;;  %vm121_vm2 = vcmp.eq.f32.partialorder %v117_v24, inf  ;;  %v124_v31 = vand.u32 2147483648, %v117_v24 }
 0x1bd   :  { %vm123_vm3 = vcmp.eq.f32.partialorder %v117_v24, 0.0 }
 0x1be   :  { %v118_v27 = vadd.f32 1e-05, %v116_v26 }
 0x1c0   :  { %908 = vrsqrt.f32 %v118_v27  ;;  %vm128_vm4 = vcmp.eq.f32.partialorder %v118_v27, inf  ;;  %v131_v35 = vand.u32 2147483648, %v118_v27  ;;  %vm130_vm5 = vcmp.eq.f32.partialorder %v118_v27, 0.0 }
 0x1c6   :  { %v907_v28 = vpop.eup %906 }
 0x1c7   :  { %v120_v29 = vmul.f32 %v907_v28, %v117_v24 }
 0x1c9   :  { %v122_v30 = vsel %vm121_vm2, %v117_v24, %v120_v29 }
 0x1ca   :  { %v909_v32 = vpop.eup %908  ;;  %v1024_v33 = vsel %vm123_vm3, %v124_v31, %v122_v30 }
 0x1cb   :  { %v127_v34 = vmul.f32 %v909_v32, %v118_v27  ;;  %910 = vrcp.f32 %v1024_v33 }
 0x1cd   :  { %v129_v36 = vsel %vm128_vm4, %v118_v27, %v127_v34 }
 0x1ce   :  { %v1027_v37 = vsel %vm130_vm5, %v131_v35, %v129_v36  ;;  %v787_v35 = vld [vmem:[#allocation2 + $0x80] ss:$0 sm:$0xff] }
 0x1cf   :  { %912 = vrcp.f32 %v1027_v37 }
 0x1d5   :  { %v911_v38 = vpop.eup %910 }
 0x1d6   :  { %v134_v40 = vmul.f32 %v911_v38, %v105_v13  ;;  %v204_v38 = vld [vmem:[#allocation2 + $0x88] sm:$0xff] }
 0x1d9   :  { %v913_v39 = vpop.eup %912 }
 0x1da   :  { %v136_v41 = vmul.f32 %v913_v39, %v106_v12  ;;  %v205_v39 = vld [vmem:[#allocation2 + $0x90] sm:$0xff] }
 0x1dc   :  { %v140_v42 = vpack.c.bf16 %v136_v41, %v134_v40 }
 0x1de   :  { %833 = vmatmul.mubr.msk.bf16.vlgmr.msra.gmra.mrb[0].mxu0 %vm95_vm0, %v140_v42  ;;  %v356_v42 = vpack.c.bf16 %v205_v39, %v204_v38 }
 0x1df   :  { %852 = vmatprep.mubr.msk.bf16.mxu0 %vm966_vm1, %v965_v20  ;;  %845 = vmatpush3.bf16.msra.mxu0 %v292_v59 }
 0x1e0   :  { %846 = vmatprep.subr.bf16.mxu0 %v965_v20 }
 0x1e3   :  { %847 = vmatpush3.bf16.msra.mxu0 %v293_v62 }
 0x1e4   :  { %848 = vmatprep.subr.bf16.mxu0 %v965_v20 }
 0x1e7   :  { %849 = vmatpush3.bf16.msra.mxu0 %v294_v1  ;;  %v420_v1 = vld [vmem:[#allocation2 + $0xb8] sm:$0xff] }
 0x1e8   :  { %850 = vmatprep.subr.bf16.mxu0 %v965_v20  ;;  %v439_v2 = vpack.c.bf16 %v420_v1, %v419_v0  ;;  %v795_v0 = vld [vmem:[#allocation2 + $0x118] ss:$0 sm:$0xff] }
 0x1eb   :  { %851 = vmatpush3.bf16.msra.mxu0 %v295_v4  ;;  %v422_v4 = vld [vmem:[#allocation2 + $0xc8] sm:$0xff] }
 0x1ec   :  { %872 = vmatprep.subr.bf16.mxu0 %v965_v20 }
 0x2b1   :  { %v183_v50 = vpop.f32.mrb[0].mxu0 }
 0x2b2   :  { %v834_v51 = vpop.f32.mrb[1].mxu0  ;;  %v1035_v53 = vadd.f32 %v781_v49, %v183_v50 }
 0x2b3   :  { %v186_v52 = vpop.f32.mrb[2].mxu0 }
 0x2b4   :  { %v1037_v54 = vadd.f32 %v781_v49, %v186_v52  ;;  %v835_v55 = vpop.f32.mrb[3].mxu0  ;;  %v206_v52 = vld [vmem:[#allocation2 + $0x98] sm:$0xff] }
 0x2b5   :  { %v207_v55 = vld [vmem:[#allocation2 + $0xa0] sm:$0xff] }
 0x2b6   :  { %v209_v56 = vpack.c.bf16 %v1037_v54, %v1035_v53 }
 0x2b8   :  { %841 = vmatmul.mubr.msk.bf16.vlgmr.msra.gmra.mrb[0].mxu1 %vm216_vm6, %v209_v56  ;;  %v357_v56 = vpack.c.bf16 %v207_v55, %v206_v52 }
 0x2b9   :  { %860 = vmatprep.mubr.msk.bf16.mxu1 %vm966_vm1, %v965_v20  ;;  %857 = vmatpush3.bf16.msra.mxu1 %v356_v42 }
 0x2ba   :  { %858 = vmatprep.subr.bf16.mxu1 %v965_v20 }
 0x2bd   :  { %859 = vmatpush3.bf16.msra.mxu1 %v357_v56 }
 0x2be   :  { %864 = vmatprep.subr.bf16.mxu1 %v965_v20 }
 0x38b   :  { %v254_v6 = vpop.f32.mrb[0].mxu1 }
 0x38c   :  { %v255_v7 = vadd.f32 %v783_v5, %v254_v6  ;;  %v842_v8 = vpop.f32.mrb[1].mxu1 }
 0x38d   :  { %v257_v9 = vpop.f32.mrb[2].mxu1 }
 0x38e   :  { %v261_v12 = vmul.f32 %v255_v7, %v255_v7  ;;  %v258_v13 = vadd.f32 %v783_v5, %v257_v9  ;;  %v843_v14 = vpop.f32.mrb[3].mxu1  ;;  %v785_v46 = vmul.f32 -1.442695, %v255_v7 }
 0x38f   :  { %v424_v14 = vld [vmem:[#allocation2 + $0xd8] sm:$0xff] }
 0x390   :  { %v263_v15 = vmul.f32 %v261_v12, %v255_v7  ;;  %v262_v16 = vmul.f32 %v258_v13, %v258_v13  ;;  %v786_v47 = vmul.f32 -1.442695, %v258_v13 }
 0x392   :  { %v265_v17 = vmul.f32 0.044715, %v263_v15  ;;  %v264_v18 = vmul.f32 %v262_v16, %v258_v13  ;;  %v425_v15 = vld [vmem:[#allocation2 + $0xe0] sm:$0xff] }
 0x393   :  { %v520_v16 = vpack.c.bf16 %v425_v15, %v424_v14 }
 0x394   :  { %v267_v19 = vadd.f32 %v265_v17, %v255_v7  ;;  %v266_v21 = vmul.f32 0.044715, %v264_v18  ;;  %v426_v17 = vld [vmem:[#allocation2 + $0xe8] sm:$0xff]  ;;  %v427_v18 = vld [vmem:[#allocation2 + $0xf0] sm:$0xff] }
 0x396   :  { %v269_v22 = vmul.f32 0.7978846, %v267_v19  ;;  %v268_v23 = vadd.f32 %v266_v21, %v258_v13  ;;  %v429_v19 = vld [vmem:[#allocation2 + $0x100] sm:$0xff] }
 0x398   :  { %914 = vtanh.f32 %v269_v22  ;;  %v270_v24 = vmul.f32 0.7978846, %v268_v23  ;;  %v430_v22 = vld [vmem:[#allocation2 + $0x108] sm:$0xff]  ;;  %v431_v23 = vld [vmem:[#allocation2 + $0x110] sm:$0xff] }
 0x39a   :  { %916 = vtanh.f32 %v270_v24  ;;  %v523_v24 = vpack.c.bf16 %v431_v23, %v430_v22  ;;  %v640_v23 = vld [vmem:[#allocation2 + $0x148] sm:$0xff] }
 0x39b   :  { %918 = vpow2.f32 %v785_v46 }
 0x39c   :  { %920 = vpow2.f32 %v786_v47 }
 0x3a2   :  { %v915_v25 = vpop.eup %914 }
 0x3a3   :  { %v273_v26 = vadd.f32 1.0, %v915_v25 }
 0x3a4   :  { %v917_v27 = vpop.eup %916 }
 0x3a5   :  { %v275_v28 = vmul.f32 0.5, %v273_v26  ;;  %v274_v29 = vadd.f32 1.0, %v917_v27  ;;  %v919_v48 = vpop.eup %918 }
 0x3a6   :  { %v921_v49 = vpop.eup %920  ;;  %v285_v50 = vadd.f32 1.0, %v919_v48 }
 0x3a7   :  { %v276_v30 = vmul.f32 0.5, %v274_v29  ;;  %v277_v31 = vmul.f32 %v275_v28, %v255_v7  ;;  %v286_v51 = vadd.f32 1.0, %v921_v49  ;;  %v440_v7 = vpack.c.bf16 %v422_v4, %v421_v3  ;;  %v791_v29 = vld [vmem:[#allocation2 + $0xd0] ss:$0 sm:$0xff] }
 0x3a8   :  { %922 = vrcp.f32 %v285_v50 }
 0x3a9   :  { %v278_v32 = vmul.f32 %v276_v30, %v258_v13  ;;  %924 = vrcp.f32 %v286_v51 }
 0x3ab   :  { %v291_v34 = vpack.c.bf16 %v278_v32, %v277_v31 }
 0x3ad   :  { %853 = vmatmul.mubr.msk.bf16.vlgmr.msra.gmra.mrb[4].mxu0 %vm300_vm7, %v291_v34 }
 0x3ae   :  { %880 = vmatprep.mubr.msk.bf16.mxu0 %vm966_vm1, %v965_v20  ;;  %873 = vmatpush3.bf16.msra.mxu0 %v520_v16 }
 0x3af   :  { %874 = vmatprep.subr.bf16.mxu0 %v965_v20 }
 0x3b2   :  { %v923_v57 = vpop.eup %922 }
 0x3b3   :  { %v925_v60 = vpop.eup %924 }
 0x480   :  { %v338_v36 = vpop.f32.mrb[4].mxu0 }
 0x481   :  { %v339_v40 = vadd.f32 %v787_v35, %v338_v36  ;;  %v854_v41 = vpop.f32.mrb[5].mxu0 }
 0x482   :  { %v341_v43 = vpop.f32.mrb[6].mxu0 }
 0x483   :  { %v342_v44 = vadd.f32 %v787_v35, %v341_v43  ;;  %347 = vrot.lane.b32.xlu0 %v339_v40, %s967_s0  ;;  %v855_v45 = vpop.f32.mrb[7].mxu0 }
 0x485   :  { %349 = vrot.lane.b32.xlu1 %v342_v44, %s967_s0 }
 0x4f5   :  { %v348_v58 = vpop.permute.xlu0 %347 }
 0x4f6   :  { %v353_v59 = vmul.f32 %v923_v57, %v348_v58 }
 0x4f7   :  { %v350_v61 = vpop.permute.xlu1 %349 }
 0x4f8   :  { %v354_v62 = vmul.f32 %v925_v60, %v350_v61  ;;  %411 = vrot.lane.b32.xlu0 %v353_v59, %s967_s0  ;;  %v434_v60 = vld [vmem:[#allocation2 + $0x128] sm:$0xff]  ;;  %v435_v61 = vld [vmem:[#allocation2 + $0x130] sm:$0xff] }
 0x4fa   :  { %v355_v63 = vpack.c.bf16 %v354_v62, %v353_v59  ;;  %v433_v59 = vld [vmem:[#allocation2 + $0x120] sm:$0xff] }
 0x4fc   :  { %363 = vrot.lane.b32.xlu1 %v355_v63, %s967_s0  ;;  %v436_v63 = vld [vmem:[#allocation2 + $0x138] sm:$0xff] }
 0x4fd   :  { %v584_v1 = vpack.c.bf16 %v436_v63, %v435_v61 }
 0x500   :  { %413 = vrot.lane.b32.xlu1 %v354_v62, %s967_s0  ;;  %v583_v62 = vpack.c.bf16 %v434_v60, %v433_v59 }
 0x56a   :  { %v412_v6 = vpop.permute.xlu0 %411 }
 0x56b   :  { %v417_v9 = vsub.f32 %v1035_v53, %v412_v6  ;;  %v521_v53 = vpack.c.bf16 %v427_v18, %v426_v17 }
 0x56d   :  { %875 = vmatpush3.bf16.msra.mxu0 %v521_v53 }
 0x56e   :  { %v364_v5 = vpop.permute.xlu1 %363  ;;  %876 = vmatprep.subr.bf16.mxu0 %v965_v20 }
 0x56f   :  { %861 = vmatmul.mubr.msk.bf16.vlgmr.msra.gmra.mrb[4].mxu1 %vm216_vm6, %v364_v5 }
 0x570   :  { %865 = vmatpush3.bf16.msra.mxu1 %v439_v2  ;;  %868 = vmatprep.mubr.msk.bf16.mxu1 %vm966_vm1, %v965_v20 }
 0x571   :  { %866 = vmatprep.subr.bf16.mxu1 %v965_v20 }
 0x572   :  { %v414_v8 = vpop.permute.xlu1 %413 }
 0x573   :  { %v418_v12 = vsub.f32 %v1037_v54, %v414_v8  ;;  %v428_v54 = vld [vmem:[#allocation2 + $0xf8] sm:$0xff] }
 0x574   :  { %867 = vmatpush3.bf16.msra.mxu1 %v440_v7  ;;  %v522_v21 = vpack.c.bf16 %v429_v19, %v428_v54 }
 0x575   :  { %v438_v13 = vpack.c.bf16 %v418_v12, %v417_v9  ;;  %884 = vmatprep.subr.bf16.mxu1 %v965_v20 }
 0x576   :  { %877 = vmatpush3.bf16.msra.mxu0 %v522_v21 }
 0x577   :  { %869 = vmatmul.mubr.msk.bf16.vlgmr.msra.gmra.mrb[8].mxu1 %vm216_vm6, %v438_v13  ;;  %878 = vmatprep.subr.bf16.mxu0 %v965_v20 }
 0x578   :  { %888 = vmatprep.mubr.msk.bf16.mxu1 %vm966_vm1, %v965_v20  ;;  %885 = vmatpush3.bf16.msra.mxu1 %v583_v62 }
 0x579   :  { %886 = vmatprep.subr.bf16.mxu1 %v965_v20 }
 0x57a   :  { %879 = vmatpush3.bf16.msra.mxu0 %v523_v24  ;;  %v641_v24 = vld [vmem:[#allocation2 + $0x150] sm:$0xff] }
 0x57c   :  { %887 = vmatpush3.bf16.msra.mxu1 %v584_v1 }
 0x57d   :  { %892 = vmatprep.subr.bf16.mxu1 %v965_v20 }
 0x642   :  { %v1071_v25 = vpop.f32.mrb[4].mxu1 }
 0x643   :  { %v862_v26 = vpop.f32.mrb[5].mxu1 }
 0x644   :  { %v1073_v27 = vpop.f32.mrb[6].mxu1  ;;  %v645_v26 = vpack.c.bf16 %v641_v24, %v640_v23 }
 0x645   :  { %v863_v28 = vpop.f32.mrb[7].mxu1 }
 0x646   :  { %v642_v28 = vld [vmem:[#allocation2 + $0x158] sm:$0xff] }
 0x64a   :  { %v482_v30 = vpop.f32.mrb[8].mxu1 }
 0x64b   :  { %v483_v31 = vadd.f32 %v791_v29, %v482_v30  ;;  %v870_v32 = vpop.f32.mrb[9].mxu1 }
 0x64c   :  { %v485_v34 = vpop.f32.mrb[10].mxu1 }
 0x64d   :  { %v489_v35 = vmul.f32 %v483_v31, %v483_v31  ;;  %v486_v36 = vadd.f32 %v791_v29, %v485_v34  ;;  %v871_v38 = vpop.f32.mrb[11].mxu1  ;;  %v793_v8 = vmul.f32 -1.442695, %v483_v31  ;;  %v646_v29 = vpack.c.bf16 %v642_v28, %v642_v28 }
 0x64f   :  { %v491_v39 = vmul.f32 %v489_v35, %v483_v31  ;;  %v490_v40 = vmul.f32 %v486_v36, %v486_v36  ;;  %v794_v9 = vmul.f32 -1.442695, %v486_v36  ;;  %v657_v30 = vsel %vm655_vm8, %v646_v29, 0 }
 0x651   :  { %v493_v41 = vmul.f32 0.044715, %v491_v39  ;;  %v492_v42 = vmul.f32 %v490_v40, %v486_v36  ;;  %v798_v39 = vld [vmem:[#allocation2 + $0x140] ss:$0 sm:$0xff] }
 0x653   :  { %v495_v43 = vadd.f32 %v493_v41, %v483_v31  ;;  %v494_v44 = vmul.f32 0.044715, %v492_v42 }
 0x655   :  { %v497_v45 = vmul.f32 0.7978846, %v495_v43  ;;  %v496_v46 = vadd.f32 %v494_v44, %v486_v36 }
 0x657   :  { %926 = vtanh.f32 %v497_v45  ;;  %v498_v47 = vmul.f32 0.7978846, %v496_v46  ;;  %v799_v45 = vld [vmem:[#allocation2 + $0x160] ss:$0 sm:$0xff] }
 0x659   :  { %928 = vtanh.f32 %v498_v47 }
 0x65a   :  { %930 = vpow2.f32 %v793_v8 }
 0x65b   :  { %932 = vpow2.f32 %v794_v9 }
 0x661   :  { %v927_v48 = vpop.eup %926 }
 0x662   :  { %v501_v49 = vadd.f32 1.0, %v927_v48 }
 0x663   :  { %v929_v50 = vpop.eup %928 }
 0x664   :  { %v503_v51 = vmul.f32 0.5, %v501_v49  ;;  %v502_v52 = vadd.f32 1.0, %v929_v50  ;;  %v931_v12 = vpop.eup %930 }
 0x665   :  { %v933_v13 = vpop.eup %932  ;;  %v513_v14 = vadd.f32 1.0, %v931_v12 }
 0x666   :  { %v504_v55 = vmul.f32 0.5, %v502_v52  ;;  %v505_v56 = vmul.f32 %v503_v51, %v483_v31  ;;  %v514_v15 = vadd.f32 1.0, %v933_v13  ;;  %v789_v31 = vld [vmem:[#allocation2 + $0xa8] ss:$0 sm:$0xff] }
 0x667   :  { %934 = vrcp.f32 %v513_v14  ;;  %v403_v32 = vadd.f32 %v789_v31, %v1071_v25  ;;  %v406_v35 = vadd.f32 %v789_v31, %v1073_v27 }
 0x668   :  { %v506_v57 = vmul.f32 %v504_v55, %v486_v36  ;;  %936 = vrcp.f32 %v514_v15 }
 0x66a   :  { %v519_v58 = vpack.c.bf16 %v506_v57, %v505_v56 }
 0x66c   :  { %881 = vmatmul.mubr.msk.bf16.vlgmr.msra.gmra.mrb[8].mxu0 %vm300_vm7, %v519_v58 }
 0x671   :  { %v935_v17 = vpop.eup %934 }
 0x672   :  { %v937_v18 = vpop.eup %936 }
 0x73f   :  { %v565_v2 = vpop.f32.mrb[8].mxu0 }
 0x740   :  { %v566_v3 = vadd.f32 %v795_v0, %v565_v2  ;;  %v882_v4 = vpop.f32.mrb[9].mxu0 }
 0x741   :  { %v568_v5 = vpop.f32.mrb[10].mxu0 }
 0x742   :  { %v569_v6 = vadd.f32 %v795_v0, %v568_v5  ;;  %574 = vrot.lane.b32.xlu0 %v566_v3, %s967_s0  ;;  %v883_v7 = vpop.f32.mrb[11].mxu0 }
 0x744   :  { %576 = vrot.lane.b32.xlu1 %v569_v6, %s967_s0 }
 0x7b4   :  { %v575_v16 = vpop.permute.xlu0 %574 }
 0x7b5   :  { %v580_v54 = vmul.f32 %v935_v17, %v575_v16 }
 0x7b6   :  { %v577_v53 = vpop.permute.xlu1 %576 }
 0x7b7   :  { %v581_v19 = vmul.f32 %v937_v18, %v577_v53 }
 0x7b9   :  { %v582_v21 = vpack.c.bf16 %v581_v19, %v580_v54 }
 0x7bb   :  { %586 = vrot.lane.b32.xlu0 %v582_v21, %s967_s0 }
 0x82d   :  { %v587_v22 = vpop.permute.xlu0 %586 }
 0x82e   :  { %889 = vmatmul.mubr.msk.bf16.vlgmr.msra.gmra.mrb[12].mxu1 %vm216_vm6, %v587_v22 }
 0x82f   :  { %896 = vmatprep.mubr.msk.bf16.mxu1 %vm966_vm1, %v965_v20  ;;  %893 = vmatpush3.bf16.msra.mxu1 %v645_v26 }
 0x830   :  { %894 = vmatprep.subr.bf16.mxu1 %v965_v20 }
 0x833   :  { %895 = vmatpush3.bf16.msra.mxu1 %v657_v30 }
 0x901   :  { %v625_v34 = vpop.f32.mrb[12].mxu1 }
 0x902   :  { %v632_v36 = vadd.f32 %v625_v34, %v403_v32  ;;  %v890_v38 = vpop.f32.mrb[13].mxu1 }
 0x903   :  { %v628_v40 = vpop.f32.mrb[14].mxu1 }
 0x904   :  { %v633_v41 = vadd.f32 %v628_v40, %v406_v35  ;;  %v891_v42 = vpop.f32.mrb[15].mxu1  ;;  %v638_v43 = vadd.f32 %v798_v39, %v632_v36 }
 0x906   :  { %v639_v44 = vadd.f32 %v798_v39, %v633_v41 }
 0x908   :  { %v644_v20 = vpack.c.bf16 %v639_v44, %v638_v43 }
 0x90a   :  { %897 = vmatmul.mubr.msk.bf16.vlgmr.msra.gmra.mrb[16].mxu1 %vm651_vm9, %v644_v20 }
 0x9dd   :  { %v693_v46 = vpop.f32.mrb[16].mxu1 }
 0x9de   :  { %v694_v47 = vadd.f32 %v799_v45, %v693_v46  ;;  %v898_v48 = vpop.f32.mrb[17].mxu1 }
 0x9df   :  { %v696_v49 = vpop.f32.mrb[18].mxu1 }
 0x9e0   :  { %v700_v25 = vmul.f32 %v694_v47, %v1024_v33  ;;  %v697_v50 = vadd.f32 %v799_v45, %v696_v49  ;;  %v899_v27 = vpop.f32.mrb[19].mxu1 }
 0x9e2   :  { %v701_v51 = vmul.f32 %v697_v50, %v1027_v37  ;;  %v702_v52 = vadd.f32 %v700_v25, %v1011_v11 }
 0x9e4   :  { %704 = vxpose.xlu1.b32.start.end [1/1] (short) (narrow) %v702_v52, 16  ;;  %v703_v55 = vadd.f32 %v701_v51, %v1009_v10 }
 0x9e6   :  { %739 = vxpose.xlu0.b32.start.end [1/1] (short) (narrow) %v703_v55, 16 }
 0xa64   :  { %v720_v56 = vpop.trf.xlu1 }
 0xa65   :  { %737 = vst.msk [vmem:[%s1105_s2] sm:$0xff] %vm736_vm10, %v720_v56 }
 0xa66   :  { %v755_v57 = vpop.trf.xlu0 }
 0xa67   :  { %801 = vst.msk [vmem:[%s1105_s2 + $0x10] sm:$0xff] %vm736_vm10, %v755_v57 }
 0xa68   :  { %v721_v33 = vpop.trf.xlu1 }
 0xa69   :  { %738 = vst.msk [vmem:[%s1105_s2 + $0x8] sm:$0xff] %vm736_vm10, %v721_v33 }
 0xa6a   :  { %v756_v11 = vpop.trf.xlu0 }
 0xa6b   :  { %802 = vst.msk [vmem:[%s1105_s2 + $0x18] sm:$0xff] %vm736_vm10, %v756_v11 }
 0xa6c   :  { %778 = vsyncpa [#allocation3], 1 }

</bundles_post_ra>
